<compile_context>
chip_gen: v7x
topology: tpu7x:2x2x1
jax: 0.10.0
libtpu: 0.0.40
codegen_flags: <defaults>
</compile_context>

<pallas_src>
import functools

import jax
import jax.numpy as jnp
from jax.experimental import pallas as pl
from jax.experimental.pallas import tpu as pltpu

# ---------------- model hyper-parameters (small, consistent with module) ----
DDPG_EPS = 0.003
STATE_DIM = 16        # state_dim
ACTION_DIM = 4        # action_dim
HIDDEN_S = 32         # args.hidden_s
BATCH = 2             # n

SA = STATE_DIM + ACTION_DIM                 # 20
SA_PAD = ((SA + 7) // 8) * 8                # 24  (sublane-aligned input width)
H2 = 2 * HIDDEN_S                           # 64
SLAB_ROWS = SA_PAD + 3                      # W1 rows + b1 + w3_row + b3 row


def _round_up(x, m):
    return ((x + m - 1) // m) * m


# ---------------- fused critic kernel ----------------------------------------
def critic_kernel(x_ref, p_ref, out_ref):
    """x_ref: [tb, SA_PAD]   p_ref: [SLAB_ROWS, 2H]   out_ref: [tb, 1]"""
    w1 = p_ref[0:SA_PAD, :]                       # block-diag [[ws1,0],[0,wa1]]
    b1 = p_ref[SA_PAD:SA_PAD + 1, :]              # [1, 2H] = [bs1 | ba1]
    w3 = p_ref[SA_PAD + 1:SA_PAD + 2, :]          # [1, 2H] fc3 weight row
    b3 = p_ref[SA_PAD + 2:SA_PAD + 3, 0:1]        # [1, 1]  fc3 bias

    # h = relu([state|action] @ [[ws1,0],[0,wa1]] + [bs1|ba1])  == cat(s1, a1)
    h = jnp.maximum(
        jnp.dot(x_ref[...], w1, preferred_element_type=jnp.float32) + b1, 0.0)

    # fc3: width-1 matmul done as VPU mul + lane reduction (no MXU push/drain)
    out_ref[...] = jnp.sum(h * w3, axis=-1, keepdims=True) + b3


# ---------------- parameter init (deterministic, kernel-ready layout) -------
def _uniform(key, shape, bound):
    return jax.random.uniform(key, shape, jnp.float32, -bound, bound)


def init_params(key):
    k = jax.random.split(key, 6)
    H, S, A = HIDDEN_S, STATE_DIM, ACTION_DIM

    # fcs1: fanin_init(size=(H,S)) -> bound 1/sqrt(H) (original code's quirk);
    #       bias uses torch Linear default 1/sqrt(in_features).
    ws1 = _uniform(k[0], (S, H), 1.0 / H ** 0.5)        # stored [in, out]
    bs1 = _uniform(k[1], (1, H), 1.0 / S ** 0.5)
    # fca1: same quirk.
    wa1 = _uniform(k[2], (A, H), 1.0 / H ** 0.5)
    ba1 = _uniform(k[3], (1, H), 1.0 / A ** 0.5)
    # fc3: weight U(-DDPG_EPS, DDPG_EPS); bias torch default.
    w3 = _uniform(k[4], (2 * H, 1), DDPG_EPS)           # [2H, 1]
    b3 = _uniform(k[5], (1, 1), 1.0 / (2 * H) ** 0.5)

    # -------- pack everything into ONE kernel-ready slab -------------------
    w1 = jnp.zeros((SA_PAD, H2), jnp.float32)
    w1 = w1.at[:S, :H].set(ws1)                          # state half
    w1 = w1.at[S:S + A, H:].set(wa1)                     # action half
    b1 = jnp.concatenate([bs1, ba1], axis=1)             # [1, 2H]
    w3_row = w3.T                                        # [1, 2H]
    b3_row = jnp.zeros((1, H2), jnp.float32).at[0, 0].set(b3[0, 0])
    slab = jnp.concatenate([w1, b1, w3_row, b3_row], axis=0)   # [SLAB_ROWS, 2H]

    return {"ws1": ws1, "bs1": bs1, "wa1": wa1, "ba1": ba1,
            "w3": w3, "b3": b3, "slab": slab}


# ---------------- forward wrapper (single fused, batched pallas_call) --------
@functools.partial(jax.jit, static_argnames=("tile_b",))
def critic_forward(state, action, slab, tile_b=1024):
    n = state.shape[0]
    # [state | action], zero-padded to the sublane-aligned feature width.
    x = jnp.concatenate([state, action], axis=1)
    if x.shape[1] != SA_PAD:
        x = jnp.pad(x, ((0, 0), (0, SA_PAD - x.shape[1])))

    tb = min(tile_b, _round_up(n, 8))          # batch tile (multiple of 8)
    n_pad = _round_up(n, tb)
    if n_pad != n:
        x = jnp.pad(x, ((0, n_pad - n), (0, 0)))

    out = pl.pallas_call(
        critic_kernel,
        out_shape=jax.ShapeDtypeStruct((n_pad, 1), jnp.float32),
        grid_spec=pltpu.PrefetchScalarGridSpec(
            num_scalar_prefetch=0,
            grid=(n_pad // tb,),
            in_specs=[
                pl.BlockSpec((tb, SA_PAD), lambda i: (i, 0)),       # streamed
                pl.BlockSpec((SLAB_ROWS, H2), lambda i: (0, 0)),    # resident
            ],
            out_specs=pl.BlockSpec((tb, 1), lambda i: (i, 0)),
        ),
        compiler_params=pltpu.CompilerParams(
            dimension_semantics=("parallel",)),
    )(x, slab)
    return out[:n]


# ---------------- pure-JAX reference (mirrors the torch forward) ------------
def reference_forward(state, action, params):
    s1 = jnp.maximum(state @ params["ws1"] + params["bs1"], 0.0)
    a1 = jnp.maximum(action @ params["wa1"] + params["ba1"], 0.0)
    x = jnp.concatenate([s1, a1], axis=1)      # torch.cat((s1, a1), dim=1)
    return x @ params["w3"] + params["b3"]


if __name__ == "__main__":
    key = jax.random.PRNGKey(0)
    k_param, k_state, k_action = jax.random.split(key, 3)

    params = init_params(k_param)
    state = jax.random.normal(k_state, (BATCH, STATE_DIM), jnp.float32)
    action = jax.random.normal(k_action, (BATCH, ACTION_DIM), jnp.float32)

    out = critic_forward(state, action, params["slab"])
    out = jax.block_until_ready(out)

    ref = reference_forward(state, action, params)
    assert out.shape == (BATCH, 1)
    assert jnp.allclose(out, ref, atol=1e-5, rtol=1e-5), "mismatch vs reference"

    print("KERNEL_OK")
</pallas_src>

<mosaic_0001>
module attributes {stable_mosaic.version = 11 : i64} {
  func.func @critic_kernel(%arg0: i32, %arg1: memref<8x24xf32, #tpu.memory_space<vmem>>, %arg2: memref<27x64xf32, #tpu.memory_space<vmem>>, %arg3: memref<8x1xf32, #tpu.memory_space<vmem>>) attributes {dimension_semantics = [#tpu.dimension_semantics<parallel>], iteration_bounds = array<i64: 1>, scalar_prefetch = 0 : i64, scratch_operands = 0 : i64, tpu.core_type = #tpu.core_type<tc>, window_params = [{transform_indices = @transform_0, window_bounds = array<i64: 8, 24>}, {pipeline_mode = #tpu.pipeline_mode<synchronous>, transform_indices = @transform_1, window_bounds = array<i64: 27, 64>}, {transform_indices = @transform_2, window_bounds = array<i64: 8, 1>}]} {
    %c0 = arith.constant 0 : index
    %c0_0 = arith.constant 0 : index
    %0 = vector.load %arg2[%c0, %c0_0] : memref<27x64xf32, #tpu.memory_space<vmem>>, vector<24x64xf32>
    %c24 = arith.constant 24 : index
    %c0_1 = arith.constant 0 : index
    %1 = vector.load %arg2[%c24, %c0_1] : memref<27x64xf32, #tpu.memory_space<vmem>>, vector<1x64xf32>
    %c25 = arith.constant 25 : index
    %c0_2 = arith.constant 0 : index
    %2 = vector.load %arg2[%c25, %c0_2] : memref<27x64xf32, #tpu.memory_space<vmem>>, vector<1x64xf32>
    %c26 = arith.constant 26 : index
    %c0_3 = arith.constant 0 : index
    %3 = vector.load %arg2[%c26, %c0_3] : memref<27x64xf32, #tpu.memory_space<vmem>>, vector<1x1xf32>
    %c0_4 = arith.constant 0 : index
    %c0_5 = arith.constant 0 : index
    %4 = vector.load %arg1[%c0_4, %c0_5] : memref<8x24xf32, #tpu.memory_space<vmem>>, vector<8x24xf32>
    %cst = arith.constant dense<0.000000e+00> : vector<8x64xf32>
    %5 = tpu.matmul %4, %0, %cst {dimension_numbers = #tpu.dot_dimension_numbers<[1], [0], [0], [1], [0, 0, 1, 1], [], []>} : vector<8x24xf32>, vector<24x64xf32>, vector<8x64xf32> -> vector<8x64xf32>
    %6 = vector.broadcast %1 : vector<1x64xf32> to vector<8x64xf32>
    %7 = arith.addf %5, %6 : vector<8x64xf32>
    %cst_6 = arith.constant 0.000000e+00 : f32
    %8 = vector.broadcast %cst_6 : f32 to vector<8x64xf32>
    %9 = arith.maximumf %7, %8 : vector<8x64xf32>
    %10 = vector.broadcast %2 : vector<1x64xf32> to vector<8x64xf32>
    %11 = arith.mulf %9, %10 : vector<8x64xf32>
    %cst_7 = arith.constant dense<0.000000e+00> : vector<8xf32>
    %12 = vector.multi_reduction <add>, %11, %cst_7 [1] : vector<8x64xf32> to vector<8xf32>
    %13 = vector.shape_cast %12 : vector<8xf32> to vector<8x1xf32>
    %14 = vector.broadcast %3 : vector<1x1xf32> to vector<8x1xf32>
    %15 = arith.addf %13, %14 : vector<8x1xf32>
    %c0_8 = arith.constant 0 : index
    %c0_9 = arith.constant 0 : index
    %16 = vector.load %arg3[%c0_8, %c0_9] : memref<8x1xf32, #tpu.memory_space<vmem>>, vector<8x1xf32>
    tpu.vector_store %arg3[%c0_8, %c0_9], %15 {strides = array<i32>} : memref<8x1xf32, #tpu.memory_space<vmem>>, vector<8x1xf32>,
    return
  }
  func.func @transform_0(%arg0: i32) -> (i32, i32) {
    %c0_i32 = arith.constant 0 : i32
    %c0_i32_0 = arith.constant 0 : i32
    return %arg0, %c0_i32 : i32, i32
  }
  func.func @transform_1(%arg0: i32) -> (i32, i32) {
    %c0_i32 = arith.constant 0 : i32
    %c0_i32_0 = arith.constant 0 : i32
    %c0_i32_1 = arith.constant 0 : i32
    return %c0_i32, %c0_i32_0 : i32, i32
  }
  func.func @transform_2(%arg0: i32) -> (i32, i32) {
    %c0_i32 = arith.constant 0 : i32
    %c0_i32_0 = arith.constant 0 : i32
    return %arg0, %c0_i32 : i32, i32
  }
}

</mosaic_0001>

<bundles_post_ra>
// kernel: critic_forward.1
= control target key start
LH: loop header
LB: loop body
LE: loop exit
PB: predicated region body
PF: predicated region fallthrough
CT: control target
= control target key end

     0   :  { %7 = vsyncpa [#allocation3], 0  ;;  %s182_s9 = smov [#allocation2]   ;;  %s221_s0 = inlined_call_operand.vmem [shape: f32[8,24], index: 0, kind: input, shape index: {}]   ;;  %s222_s1 = inlined_call_operand.hbm [shape: f32[27,64], index: 1, kind: input, shape index: {}]   ;;  %s223_s2 = inlined_call_operand.vmem [shape: f32[8,1], index: 2, kind: output, shape index: {}]  }
   0x1   :  { %s15_s10 = sshll.u32 %s182_s9, 4  ;;  %s158_s13 = scalar_lea.hbm %s222_s1, 512  ;;  %s16_s10 = int_to_ptr.vmem [resolvable:$true] %s15_s10 }
   0x2   :  { %p159_p0 = scmp.ne.s32.totalorder %s222_s1, %s158_s13  ;;  %p162_p1 = scmp.lt.u32.totalorder %s158_s13, %s222_s1 }
   0x4   :  { %p164_p2 = pnand %p162_p1, %p159_p0 }
   0x6   :  { %167 = shalt.err (!%p164_p2)
}
   0x7   :  { %s168_s18 = scalar_lea.vmem %s16_s10, 512  ;;  %p173_p4 = scmp.lt.s32.totalorder %s16_s10, %s16_s10 }
   0x8   :  { %p169_p3 = scmp.ne.s32.totalorder %s16_s10, %s168_s18  ;;  %p174_p5 = scmp.lt.s32.totalorder %s168_s18, %s168_s18 }
   0xa   :  { %p175_p6 = por %p174_p5, %p173_p4 }
   0xc   :  { %p176_p7 = pnand %p175_p6, %p169_p3 }
   0xe   :  { %179 = shalt.err (!%p176_p7)
}
   0xf   :  { %s183_s19 = smov 128   ;;  %s184_s20 = smov 8  }
  0x10   :  { %21 = dma.hbm_to_vmem [thread:$0]  %s222_s1, 512, %s16_s10, [#allocation3], %s183_s19, %s183_s19, %s184_s20  }
  0x11   :  { %180 = dma.done.wait [#allocation3], 512  }
  0x12   :  { %181 = vsyncadd [#allocation3], 4294966784  ;;  %v185_v0 = vmov 0.0|0.0   ;;  %vm186_vm0 = vmmov 0   ;;  %v187_v1 = vmov 0.0   ;;  %v25_v2 = vld [vmem:[#allocation2] sm:$0xff] }
  0x13   :  { %149 = vmatprep.subr.bf16.mxu0 %v185_v0  ;;  %146 = vmatprep.mubr.msk.f32.mxu0 %vm186_vm0, %v187_v1  ;;  %v26_v3 = vld [vmem:[#allocation2 + $0x8] sm:$0xff]  ;;  %v27_v5 = vld [vmem:[#allocation2 + $0x10] sm:$0xff]  ;;  %v31_v6 = vld [vmem:[%s221_s0] sm:$0xff]  ;;  %vm36_vm1 = vcmask 195584   ;;  %vm116_vm2 = vcmask 523264   ;;  %vm125_vm3 = vcmask 7168  }
  0x14   :  { %v150_v4 = vpack.c.bf16 %v26_v3, %v25_v2  ;;  %v132_v7 = vld [vmem:[#allocation2 + $0x18] ss:$0 sm:$0xff]  ;;  %v134_v11 = vld [vmem:[#allocation2 + $0x19] ss:$0 sm:$0xff]  ;;  %v135_v15 = vld [vmem:[#allocation2 + $0x1a] ss:$0 sm:$0xff] }
  0x16   :  { %151 = vmatpush3.bf16.msra.mxu0 %v150_v4 }
  0x17   :  { %144 = vmatprep.subr.mxu0 %v187_v1 }
  0x1a   :  { %145 = vmatpush3.msra.mxu0 %v27_v5 }
  0x1b   :  { %147 = vmatmul.mubr.msk.f32.vlgmr.msra.gmra.mrb[0].mxu0 %vm36_vm1, %v31_v6 }
  0xee   :  { %v106_v8 = vpop.f32.mrb[0].mxu0 }
  0xef   :  { %v107_v9 = vadd.f32 %v132_v7, %v106_v8  ;;  %v148_v10 = vpop.f32.mrb[1].mxu0 }
  0xf1   :  { %v110_v12 = vmax.f32 %v107_v9, 0.0 }
  0xf3   :  { %v115_v13 = vmul.f32 %v134_v11, %v110_v12 }
  0xf5   :  { %v117_v14 = vsel %vm116_vm2, %v115_v13, 0.0 }
  0xf6   :  { %118 = vadd.xlane.f32.xlu0 %v117_v14 }
 0x183   :  { %v119_v16 = vpop.xlane.xlu0 %118 }
 0x184   :  { %v124_v17 = vadd.f32 %v135_v15, %v119_v16 }
 0x186   :  { %126 = vst.msk [vmem:[%s223_s2] sm:$0xff] %vm125_vm3, %v124_v17 }
 0x187   :  { %131 = vsyncpa [#allocation3], 1 }

</bundles_post_ra>
